<compile_context>
chip_gen: v7x
topology: tpu7x:2x2x1
jax: 0.10.0
libtpu: 0.0.40
codegen_flags: <defaults>
</compile_context>

<pallas_src>
import functools

import jax
import jax.numpy as jnp
from jax.experimental import pallas as pl
from jax.experimental.pallas import tpu as pltpu


def _round_up(x, m):
    return ((x + m - 1) // m) * m


def regression_head_kernel(x_ref, w1_ref, b1_ref, w2_ref, b2_ref, o_ref,
                           acc_ref, *, tanh_dtype):
    """Grid: (batch tiles, K chunks of the dense contraction)."""
    k = pl.program_id(1)
    nk = pl.num_programs(1)

    @pl.when(k == 0)
    def _():
        acc_ref[...] = jnp.zeros_like(acc_ref)

    # dense: accumulate x-chunk @ W-chunk on the MXU with f32 accumulation.
    x = x_ref[...]
    if x.dtype != w1_ref.dtype:
        x = x.astype(w1_ref.dtype)      # in-kernel operand cast (VPU has slack)
    acc_ref[...] += jnp.dot(x, w1_ref[...], preferred_element_type=jnp.float32)

    @pl.when(k == nk - 1)
    def _():
        # Bias add in f32; tanh in tanh_dtype (bf16 on v6e/v7x halves EUP work
        # and removes a separate cast); out_proj on the MXU, f32 accumulation.
        h = acc_ref[...] + b1_ref[...]
        h = jnp.tanh(h.astype(tanh_dtype)).astype(w2_ref.dtype)
        out = jnp.dot(h, w2_ref[...], preferred_element_type=jnp.float32) + b2_ref[...]
        o_ref[...] = out.astype(o_ref.dtype)


def prepare_regression_head_params(w_dense, b_dense, w_out, b_out, *,
                                    compute_dtype=jnp.float32):
    """One-time (model-load) weight preparation. Do NOT call per inference.

    w_dense: [H, H] ([in, out], i.e. PyTorch dense.weight.T)
    b_dense: [H] or [1, H]
    w_out:   [H, L] ([in, out], i.e. PyTorch out_proj.weight.T)
    b_out:   [L] or [1, L]
    compute_dtype: MXU operand dtype (bf16 recommended on v6e/v7x, and on v5e
      too in the weight-DMA-bound serving regime). Accumulation stays f32.
    """
    H = w_dense.shape[0]
    L = w_out.shape[-1]
    Lp = _round_up(max(L, 1), 128)          # lane-dense output -> unmasked vst
    w1 = jnp.asarray(w_dense, compute_dtype)
    b1 = jnp.asarray(b_dense, jnp.float32).reshape(1, H)
    w2 = jnp.zeros((H, Lp), compute_dtype).at[:, :L].set(
        jnp.asarray(w_out, compute_dtype))
    b2 = jnp.zeros((1, Lp), jnp.float32).at[:, :L].set(
        jnp.asarray(b_out, jnp.float32).reshape(1, L))
    # TODO(synk): optional int8 (v5e/v6e) / fp8 (v7x) weight path with per-channel
    # f32 rescale after accumulation to cut the weight-DMA floor further.
    return {"w1": w1, "b1": b1, "w2": w2, "b2": b2, "hidden": H, "num_labels": L}


def regression_head(features, params, *, tile_b=512, out_dtype=None, tanh_dtype=None):
    """features: [B, H] -> [B, num_labels] (dropout is identity at inference)."""
    w1, b1, w2, b2 = params["w1"], params["b1"], params["w2"], params["b2"]
    H, L, Lp = params["hidden"], params["num_labels"], w2.shape[1]
    B = features.shape[0]
    assert features.shape[1] == H, (features.shape, H)
    compute_dtype = w1.dtype
    if out_dtype is None:
        out_dtype = features.dtype      # pass bf16 here if downstream accepts it
    if tanh_dtype is None:
        # bf16 EUP exists on v6e/v7x; pass tanh_dtype=jnp.float32 explicitly on v5e.
        tanh_dtype = jnp.bfloat16 if compute_dtype == jnp.bfloat16 else jnp.float32

    # --- batch tiling (no jnp.pad: ragged last block is masked by Pallas) ---
    tile_b = max(8, _round_up(tile_b, 8))
    if B > tile_b:
        tile_b_eff = tile_b                         # multiple of 8; ragged tail ok
    elif B >= 256:
        tile_b_eff = _round_up(pl.cdiv(B, 2), 8)    # >=2 steps -> both v7x TCs busy
    else:
        tile_b_eff = B                              # single full-extent block
    num_b_tiles = pl.cdiv(B, tile_b_eff)

    # --- contraction tiling: stream w_dense in chunks only when the whole batch
    # is a single tile (hides the startup weight DMA behind MXU work); otherwise
    # keep W resident so it is fetched from HBM exactly once across all tiles. ---
    if num_b_tiles == 1 and H > 256 and H % 256 == 0:
        tk = 256
    else:
        tk = H
    nk = H // tk

    x_isz = jnp.dtype(features.dtype).itemsize
    w_isz = jnp.dtype(compute_dtype).itemsize
    o_isz = jnp.dtype(out_dtype).itemsize

    flops = 2 * B * H * (H + Lp)
    bytes_accessed = (B * H * x_isz + H * H * w_isz + H * Lp * w_isz
                      + (H + Lp) * 4 + B * Lp * o_isz)
    # Pipeliner double-buffers every input/output block; accumulator is single.
    vmem_bytes = (2 * tile_b_eff * tk * x_isz        # x tiles
                  + 2 * tk * H * w_isz               # w_dense chunk
                  + 2 * H * 4                        # b_dense
                  + 2 * H * Lp * w_isz               # w_out (padded)
                  + 2 * Lp * 4                       # b_out (padded)
                  + 2 * tile_b_eff * Lp * o_isz      # output tile
                  + tile_b_eff * H * 4)              # f32 accumulator scratch
    vmem_limit = int(min(max(vmem_bytes + (8 << 20), 32 << 20), 48 << 20))

    kernel = functools.partial(regression_head_kernel, tanh_dtype=tanh_dtype)

    out_padded = pl.pallas_call(
        kernel,
        out_shape=jax.ShapeDtypeStruct((B, Lp), out_dtype),
        grid=(num_b_tiles, nk),
        in_specs=[
            pl.BlockSpec((tile_b_eff, tk), lambda i, k: (i, k)),   # x (batch, K chunk)
            pl.BlockSpec((tk, H), lambda i, k: (k, 0)),            # w_dense chunk
            pl.BlockSpec((1, H), lambda i, k: (0, 0)),             # b_dense (resident)
            pl.BlockSpec((H, Lp), lambda i, k: (0, 0)),            # w_out pad (resident)
            pl.BlockSpec((1, Lp), lambda i, k: (0, 0)),            # b_out pad (resident)
        ],
        out_specs=pl.BlockSpec((tile_b_eff, Lp), lambda i, k: (i, 0)),
        scratch_shapes=[pltpu.VMEM((tile_b_eff, H), jnp.float32)],
        compiler_params=pltpu.CompilerParams(
            dimension_semantics=("parallel", "arbitrary"),
            vmem_limit_bytes=vmem_limit,
        ),
        cost_estimate=pl.CostEstimate(
            flops=flops, transcendentals=B * H, bytes_accessed=bytes_accessed),
    )(features, w1, b1, w2, b2)

    return out_padded[:, :L]


def reference(features, w_dense, b_dense, w_out, b_out):
    h = jnp.tanh(features @ w_dense + b_dense.reshape(1, -1))
    return h @ w_out + b_out.reshape(1, -1)


if __name__ == "__main__":
    # Toy config: hidden_size=32, num_labels=3 (arousal/dominance/valence),
    # batch=2 pooled feature vectors. Deployed wav2vec2-large uses H=1024, L=3.
    B, H, L = 2, 32, 3

    key = jax.random.PRNGKey(0)
    k_x, k_w1, k_b1, k_w2, k_b2, k_x2 = jax.random.split(key, 6)

    features = jax.random.normal(k_x, (B, H), dtype=jnp.float32)
    # PyTorch Linear stores weight as [out, in]; pass [in, out] (i.e. weight.T).
    w_dense = jax.random.normal(k_w1, (H, H), dtype=jnp.float32) * 0.05
    b_dense = jax.random.normal(k_b1, (1, H), dtype=jnp.float32) * 0.05
    w_out = jax.random.normal(k_w2, (H, L), dtype=jnp.float32) * 0.05
    b_out = jax.random.normal(k_b2, (1, L), dtype=jnp.float32) * 0.05

    ref = reference(features, w_dense, b_dense, w_out, b_out)

    # f32 path (correctness gate). Weight prep runs once, outside the call path.
    params_f32 = prepare_regression_head_params(w_dense, b_dense, w_out, b_out)
    out = jax.block_until_ready(regression_head(features, params_f32))
    assert out.shape == (B, L), out.shape
    assert jnp.allclose(out, ref, atol=1e-5, rtol=1e-5), "f32 mismatch vs reference"

    # bf16 MXU-operand path (what the real H=1024 config uses on v6e/v7x);
    # accumulation/bias stay f32, tanh runs in bf16.
    params_bf16 = prepare_regression_head_params(w_dense, b_dense, w_out, b_out,
                                                 compute_dtype=jnp.bfloat16)
    out_bf16 = jax.block_until_ready(regression_head(features, params_bf16))
    assert jnp.allclose(out_bf16.astype(jnp.float32), ref, atol=5e-2, rtol=5e-2), \
        "bf16 mismatch vs reference"

    # Multi-step grid + ragged final batch tile (no host-side padding).
    B2 = 300
    features2 = jax.random.normal(k_x2, (B2, H), dtype=jnp.float32)
    ref2 = reference(features2, w_dense, b_dense, w_out, b_out)
    out2 = jax.block_until_ready(regression_head(features2, params_f32))
    assert out2.shape == (B2, L), out2.shape
    assert jnp.allclose(out2, ref2, atol=1e-5, rtol=1e-5), "ragged-batch mismatch"

    print("KERNEL_OK")
</pallas_src>

<mosaic_0001>
module attributes {stable_mosaic.version = 11 : i64} {
  func.func @regression_head_kernel(%arg0: i32, %arg1: i32, %arg2: memref<2x32xf32, #tpu.memory_space<vmem>>, %arg3: memref<32x32xf32, #tpu.memory_space<vmem>>, %arg4: memref<1x32xf32, #tpu.memory_space<vmem>>, %arg5: memref<32x128xf32, #tpu.memory_space<vmem>>, %arg6: memref<1x128xf32, #tpu.memory_space<vmem>>, %arg7: memref<2x128xf32, #tpu.memory_space<vmem>>, %arg8: memref<2x32xf32, #tpu.memory_space<vmem>>) attributes {dimension_semantics = [#tpu.dimension_semantics<parallel>, #tpu.dimension_semantics<arbitrary>], iteration_bounds = array<i64: 1, 1>, scalar_prefetch = 0 : i64, scratch_operands = 1 : i64, tpu.core_type = #tpu.core_type<tc>, window_params = [{transform_indices = @transform_0, window_bounds = array<i64: 2, 32>}, {transform_indices = @transform_1, window_bounds = array<i64: 32, 32>}, {pipeline_mode = #tpu.pipeline_mode<synchronous>, transform_indices = @transform_2, window_bounds = array<i64: 1, 32>}, {pipeline_mode = #tpu.pipeline_mode<synchronous>, transform_indices = @transform_3, window_bounds = array<i64: 32, 128>}, {pipeline_mode = #tpu.pipeline_mode<synchronous>, transform_indices = @transform_4, window_bounds = array<i64: 1, 128>}, {transform_indices = @transform_5, window_bounds = array<i64: 2, 128>}]} {
    %c0_i32 = arith.constant 0 : i32
    %0 = arith.cmpi eq, %arg1, %c0_i32 : i32
    %1 = arith.extui %0 : i1 to i32
    %c0_i32_0 = arith.constant 0 : i32
    %2 = arith.cmpi ne, %1, %c0_i32_0 : i32
    scf.if %2 {
      %cst_10 = arith.constant 0.000000e+00 : f32
      %12 = vector.broadcast %cst_10 : f32 to vector<2x32xf32>
      %c0_11 = arith.constant 0 : index
      %c0_12 = arith.constant 0 : index
      %13 = vector.load %arg8[%c0_11, %c0_12] : memref<2x32xf32, #tpu.memory_space<vmem>>, vector<2x32xf32>
      tpu.vector_store %arg8[%c0_11, %c0_12], %12 {strides = array<i32>} : memref<2x32xf32, #tpu.memory_space<vmem>>, vector<2x32xf32>,
    } else {
    }
    %c0 = arith.constant 0 : index
    %c0_1 = arith.constant 0 : index
    %3 = vector.load %arg2[%c0, %c0_1] : memref<2x32xf32, #tpu.memory_space<vmem>>, vector<2x32xf32>
    %c0_2 = arith.constant 0 : index
    %c0_3 = arith.constant 0 : index
    %4 = vector.load %arg8[%c0_2, %c0_3] : memref<2x32xf32, #tpu.memory_space<vmem>>, vector<2x32xf32>
    %c0_4 = arith.constant 0 : index
    %c0_5 = arith.constant 0 : index
    %5 = vector.load %arg3[%c0_4, %c0_5] : memref<32x32xf32, #tpu.memory_space<vmem>>, vector<32x32xf32>
    %cst = arith.constant dense<0.000000e+00> : vector<2x32xf32>
    %6 = tpu.matmul %3, %5, %cst {dimension_numbers = #tpu.dot_dimension_numbers<[1], [0], [0], [1], [0, 0, 1, 1], [], []>} : vector<2x32xf32>, vector<32x32xf32>, vector<2x32xf32> -> vector<2x32xf32>
    %7 = arith.addf %4, %6 : vector<2x32xf32>
    %c0_6 = arith.constant 0 : index
    %c0_7 = arith.constant 0 : index
    %8 = vector.load %arg8[%c0_6, %c0_7] : memref<2x32xf32, #tpu.memory_space<vmem>>, vector<2x32xf32>
    tpu.vector_store %arg8[%c0_6, %c0_7], %7 {strides = array<i32>} : memref<2x32xf32, #tpu.memory_space<vmem>>, vector<2x32xf32>,
    %c0_i32_8 = arith.constant 0 : i32
    %9 = arith.cmpi eq, %arg1, %c0_i32_8 : i32
    %10 = arith.extui %9 : i1 to i32
    %c0_i32_9 = arith.constant 0 : i32
    %11 = arith.cmpi ne, %10, %c0_i32_9 : i32
    scf.if %11 {
      %c0_10 = arith.constant 0 : index
      %c0_11 = arith.constant 0 : index
      %12 = vector.load %arg8[%c0_10, %c0_11] : memref<2x32xf32, #tpu.memory_space<vmem>>, vector<2x32xf32>
      %c0_12 = arith.constant 0 : index
      %c0_13 = arith.constant 0 : index
      %13 = vector.load %arg4[%c0_12, %c0_13] : memref<1x32xf32, #tpu.memory_space<vmem>>, vector<1x32xf32>
      %14 = vector.broadcast %13 : vector<1x32xf32> to vector<2x32xf32>
      %15 = arith.addf %12, %14 : vector<2x32xf32>
      %16 = math.tanh %15 : vector<2x32xf32>
      %c0_14 = arith.constant 0 : index
      %c0_15 = arith.constant 0 : index
      %17 = vector.load %arg5[%c0_14, %c0_15] : memref<32x128xf32, #tpu.memory_space<vmem>>, vector<32x128xf32>
      %cst_16 = arith.constant dense<0.000000e+00> : vector<2x128xf32>
      %18 = tpu.matmul %16, %17, %cst_16 {dimension_numbers = #tpu.dot_dimension_numbers<[1], [0], [0], [1], [0, 0, 1, 1], [], []>} : vector<2x32xf32>, vector<32x128xf32>, vector<2x128xf32> -> vector<2x128xf32>
      %c0_17 = arith.constant 0 : index
      %c0_18 = arith.constant 0 : index
      %19 = vector.load %arg6[%c0_17, %c0_18] : memref<1x128xf32, #tpu.memory_space<vmem>>, vector<1x128xf32>
      %20 = vector.broadcast %19 : vector<1x128xf32> to vector<2x128xf32>
      %21 = arith.addf %18, %20 : vector<2x128xf32>
      %c0_19 = arith.constant 0 : index
      %c0_20 = arith.constant 0 : index
      %22 = vector.load %arg7[%c0_19, %c0_20] : memref<2x128xf32, #tpu.memory_space<vmem>>, vector<2x128xf32>
      tpu.vector_store %arg7[%c0_19, %c0_20], %21 {strides = array<i32>} : memref<2x128xf32, #tpu.memory_space<vmem>>, vector<2x128xf32>,
    } else {
    }
    return
  }
  func.func @transform_0(%arg0: i32, %arg1: i32) -> (i32, i32) {
    %c0_i32 = arith.constant 0 : i32
    return %arg0, %arg1 : i32, i32
  }
  func.func @transform_1(%arg0: i32, %arg1: i32) -> (i32, i32) {
    %c0_i32 = arith.constant 0 : i32
    %c0_i32_0 = arith.constant 0 : i32
    return %arg1, %c0_i32 : i32, i32
  }
  func.func @transform_2(%arg0: i32, %arg1: i32) -> (i32, i32) {
    %c0_i32 = arith.constant 0 : i32
    %c0_i32_0 = arith.constant 0 : i32
    %c0_i32_1 = arith.constant 0 : i32
    return %c0_i32, %c0_i32_0 : i32, i32
  }
  func.func @transform_3(%arg0: i32, %arg1: i32) -> (i32, i32) {
    %c0_i32 = arith.constant 0 : i32
    %c0_i32_0 = arith.constant 0 : i32
    %c0_i32_1 = arith.constant 0 : i32
    return %c0_i32, %c0_i32_0 : i32, i32
  }
  func.func @transform_4(%arg0: i32, %arg1: i32) -> (i32, i32) {
    %c0_i32 = arith.constant 0 : i32
    %c0_i32_0 = arith.constant 0 : i32
    %c0_i32_1 = arith.constant 0 : i32
    return %c0_i32, %c0_i32_0 : i32, i32
  }
  func.func @transform_5(%arg0: i32, %arg1: i32) -> (i32, i32) {
    %c0_i32 = arith.constant 0 : i32
    %c0_i32_0 = arith.constant 0 : i32
    return %arg0, %c0_i32 : i32, i32
  }
}

</mosaic_0001>

<bundles_post_ra>
// kernel: tpu_custom_call.1
= control target key start
LH: loop header
LB: loop body
LE: loop exit
PB: predicated region body
PF: predicated region fallthrough
CT: control target
= control target key end

     0   :  { %10 = vsyncpa [#allocation4], 0  ;;  %s519_s0 = inlined_call_operand.hbm [shape: f32[2,32], index: 0, kind: input, shape index: {}]   ;;  %s520_s1 = inlined_call_operand.hbm [shape: f32[32,32], index: 1, kind: input, shape index: {}]   ;;  %s521_s2 = inlined_call_operand.vmem [shape: f32[1,32], index: 2, kind: input, shape index: {}]   ;;  %s522_s3 = inlined_call_operand.hbm [shape: f32[32,128], index: 3, kind: input, shape index: {}]   ;;  %s523_s4 = inlined_call_operand.vmem [shape: f32[1,128], index: 4, kind: input, shape index: {}]   ;;  %s524_s5 = inlined_call_operand.hbm [shape: f32[2,128], index: 5, kind: output, shape index: {}]  }
   0x1   :  { %11 = vsyncpa [#allocation7], 0 }
   0x2   :  { %12 = vsyncpa [#allocation5], 0  ;;  %s416_s18 = smov [#allocation6]   ;;  %s322_s22 = scalar_lea.hbm %s520_s1, 512 }
   0x3   :  { %s28_s19 = sshll.u32 %s416_s18, 4  ;;  %p323_p0 = scmp.ne.s32.totalorder %s520_s1, %s322_s22  ;;  %s29_s19 = int_to_ptr.vmem [resolvable:$true] %s28_s19 }
   0x4   :  { %p326_p1 = scmp.lt.u32.totalorder %s322_s22, %s520_s1 }
   0x6   :  { %p328_p2 = pnand %p326_p1, %p323_p0 }
   0x8   :  { %331 = shalt.err (!%p328_p2)
}
   0x9   :  { %s332_s27 = scalar_lea.vmem %s29_s19, 512  ;;  %p337_p4 = scmp.lt.s32.totalorder %s29_s19, %s29_s19 }
   0xa   :  { %p333_p3 = scmp.ne.s32.totalorder %s29_s19, %s332_s27  ;;  %p338_p5 = scmp.lt.s32.totalorder %s332_s27, %s332_s27 }
   0xc   :  { %p339_p6 = por %p338_p5, %p337_p4 }
   0xe   :  { %p340_p7 = pnand %p339_p6, %p333_p3 }
  0x10   :  { %343 = shalt.err (!%p340_p7)
}
  0x11   :  { %s417_s28 = smov 128   ;;  %s418_s29 = smov 8  }
  0x12   :  { %34 = dma.hbm_to_vmem [thread:$0]  %s520_s1, 512, %s29_s19, [#allocation7], %s417_s28, %s417_s28, %s418_s29  }
  0x13   :  { %s419_s7 = smov [#allocation3]   ;;  %s420_s9 = smov [#allocation8]  }
  0x14   :  { %s19_s8 = sshll.u32 %s419_s7, 4  ;;  %s42_s10 = sshll.u32 %s420_s9, 4  ;;  %s20_s8 = int_to_ptr.vmem [resolvable:$true] %s19_s8  ;;  %s43_s10 = int_to_ptr.vmem [resolvable:$true] %s42_s10 }
  0x15   :  { %s344_s13 = scalar_lea.hbm %s519_s0, 32 }
  0x16   :  { %p345_p8 = scmp.ne.s32.totalorder %s519_s0, %s344_s13  ;;  %p348_p9 = scmp.lt.u32.totalorder %s344_s13, %s519_s0 }
  0x18   :  { %p350_p10 = pnand %p348_p9, %p345_p8 }
  0x1a   :  { %353 = shalt.err (!%p350_p10)
}
  0x1b   :  { %s354_s1 = scalar_lea.vmem %s20_s8, 32  ;;  %p359_p12 = scmp.lt.s32.totalorder %s20_s8, %s20_s8 }
  0x1c   :  { %p355_p11 = scmp.ne.s32.totalorder %s20_s8, %s354_s1  ;;  %p360_p13 = scmp.lt.s32.totalorder %s354_s1, %s354_s1 }
  0x1e   :  { %p361_p0 = por %p360_p13, %p359_p12 }
  0x20   :  { %p362_p1 = pnand %p361_p0, %p355_p11 }
  0x22   :  { %365 = shalt.err (!%p362_p1)
}
  0x23   :  { %22 = dma.hbm_to_vmem [thread:$0]  %s519_s0, 32, %s20_s8, [#allocation4]  }
  0x24   :  { %s366_s22 = scalar_lea.hbm %s522_s3, 512 }
  0x25   :  { %p367_p2 = scmp.ne.s32.totalorder %s522_s3, %s366_s22  ;;  %p370_p3 = scmp.lt.u32.totalorder %s366_s22, %s522_s3 }
  0x27   :  { %p372_p4 = pnand %p370_p3, %p367_p2 }
  0x29   :  { %375 = shalt.err (!%p372_p4)
}
  0x2a   :  { %s376_s27 = scalar_lea.vmem %s43_s10, 512  ;;  %p381_p6 = scmp.lt.s32.totalorder %s43_s10, %s43_s10 }
  0x2b   :  { %p377_p5 = scmp.ne.s32.totalorder %s43_s10, %s376_s27  ;;  %p382_p7 = scmp.lt.s32.totalorder %s376_s27, %s376_s27 }
  0x2d   :  { %p383_p8 = por %p382_p7, %p381_p6 }
  0x2f   :  { %p384_p9 = pnand %p383_p8, %p377_p5 }
  0x31   :  { %387 = shalt.err (!%p384_p9)
}
  0x32   :  { %48 = dma.hbm_to_vmem [thread:$0]  %s522_s3, 512, %s43_s10, [#allocation7], %s417_s28, %s417_s28, %s418_s29  }
  0x33   :  { %410 = dma.done.wait [#allocation4], 32  }
  0x34   :  { %411 = vsyncadd [#allocation4], 4294967264 }
  0x35   :  { %412 = dma.done.wait [#allocation7], 1024  }
  0x36   :  { %413 = vsyncadd [#allocation7], 4294966272  ;;  %vm64_vm0 = vcmask 254976   ;;  %v421_v0 = vmov 0.0|0.0   ;;  %v422_v1 = vmov 0.0   ;;  %vm423_vm1 = vmmov 0  }
  0x37   :  { %299 = vmatprep.subr.bf16.mxu0 %v421_v0  ;;  %65 = vst.msk [vmem:[#allocation2] sm:$0x3] %vm64_vm0, %v422_v1  ;;  %285 = vmatprep.mubr.msk.f32.mxu0 %vm423_vm1, %v422_v1  ;;  %v68_v2 = vld [vmem:[#allocation6] sm:$0xff]  ;;  %v69_v3 = vld [vmem:[#allocation6 + $0x8] sm:$0xff]  ;;  %v70_v4 = vld [vmem:[#allocation6 + $0x10] sm:$0xff]  ;;  %vm72_vm2 = vcmask 261120  }
  0x38   :  { %305 = vmatprep.subr.bf16.mxu1 %v421_v0  ;;  %296 = vmatprep.mubr.msk.f32.mxu1 %vm423_vm1, %v422_v1  ;;  %v300_v5 = vpack.c.bf16 %v69_v3, %v68_v2  ;;  %v71_v6 = vld [vmem:[#allocation6 + $0x18] sm:$0xff]  ;;  %v162_v9 = vld [vmem:[#allocation8] sm:$0xff]  ;;  %v163_v10 = vld [vmem:[#allocation8 + $0x8] sm:$0xff]  ;;  %s424_s7 = smov [#allocation9]  }
  0x39   :  { %v303_v7 = vpack.c.bf16 %v71_v6, %v70_v4  ;;  %v66_v8 = vld [vmem:[#allocation3] sm:$0x3]  ;;  %v164_v11 = vld [vmem:[#allocation8 + $0x10] sm:$0xff]  ;;  %v306_v12 = vpack.c.bf16 %v163_v10, %v162_v9  ;;  %v264_v19 = vld [vmem:[%s521_s2] ss:$0 sm:$0xff]  ;;  %s253_s8 = sshll.u32 %s424_s7, 4  ;;  %s254_s8 = int_to_ptr.vmem [resolvable:$true] %s253_s8 }
  0x3a   :  { %301 = vmatpush3.bf16.msra.mxu0 %v300_v5  ;;  %v165_v13 = vld [vmem:[#allocation8 + $0x18] sm:$0xff]  ;;  %s388_s9 = scalar_lea.vmem %s254_s8, 32  ;;  %p393_p11 = scmp.lt.s32.totalorder %s254_s8, %s254_s8 }
  0x3b   :  { %302 = vmatprep.subr.bf16.mxu0 %v421_v0  ;;  %307 = vmatpush3.bf16.msra.mxu1 %v306_v12  ;;  %v309_v14 = vpack.c.bf16 %v165_v13, %v164_v11  ;;  %v265_v23 = vld [vmem:[%s523_s4] ss:$0 sm:$0xff]  ;;  %p389_p10 = scmp.ne.s32.totalorder %s254_s8, %s388_s9  ;;  %p394_p12 = scmp.lt.s32.totalorder %s388_s9, %s388_s9 }
  0x3c   :  { %308 = vmatprep.subr.bf16.mxu1 %v421_v0 }
  0x3d   :  { %p395_p13 = por %p394_p12, %p393_p11 }
  0x3e   :  { %304 = vmatpush3.bf16.msra.mxu0 %v303_v7  ;;  %v67_v15 = vld [vmem:[#allocation2] sm:$0x3] }
  0x3f   :  { %310 = vmatpush3.bf16.msra.mxu1 %v309_v14  ;;  %p396_p0 = pnand %p395_p13, %p389_p10 }
  0x41   :  { %286 = vmatmul.mubr.msk.f32.vlgmr.msra.gmra.mrb[0].mxu0 %vm72_vm2, %v66_v8 }
 0x114   :  { %v142_v16 = vpop.f32.mrb[0].mxu0 }
 0x115   :  { %v146_v17 = vadd.f32 %v142_v16, %v67_v15  ;;  %v287_v18 = vpop.f32.mrb[1].mxu0 }
 0x117   :  { %148 = vst.msk [vmem:[#allocation2] sm:$0x3] %vm64_vm0, %v146_v17 }
 0x11e   :  { %v152_v20 = vld [vmem:[#allocation2] sm:$0x3] }
 0x11f   :  { %v160_v21 = vadd.f32 %v264_v19, %v152_v20 }
 0x121   :  { %320 = vtanh.f32 %v160_v21 }
 0x12b   :  { %v321_v22 = vpop.eup %320 }
 0x12c   :  { %297 = vmatmul.mubr.msk.f32.vlgmr.msra.gmra.mrb[0].mxu1 %vm72_vm2, %v321_v22 }
 0x1ff   :  { %v242_v24 = vpop.f32.mrb[0].mxu1 }
 0x200   :  { %v243_v25 = vadd.f32 %v265_v23, %v242_v24  ;;  %v298_v26 = vpop.f32.mrb[1].mxu1 }
 0x202   :  { %246 = vst [vmem:[#allocation9] sm:$0x3] %v243_v25 }
 0x203   :  { %399 = shalt.err (!%p396_p0)
}
 0x204   :  { %s400_s11 = scalar_lea.hbm %s524_s5, 32 }
 0x205   :  { %p401_p1 = scmp.ne.s32.totalorder %s524_s5, %s400_s11  ;;  %p404_p2 = scmp.lt.u32.totalorder %s400_s11, %s524_s5 }
 0x207   :  { %p406_p3 = pnand %p404_p2, %p401_p1 }
 0x209   :  { %409 = shalt.err (!%p406_p3)
}
 0x20a   :  { %256 = dma.vmem_to_hbm [thread:$0]  %s254_s8, 32, %s524_s5, [#allocation5]  }
 0x20b   :  { %414 = dma.done.wait [#allocation5], 32  }
 0x20c   :  { %415 = vsyncadd [#allocation5], 4294967264 }
 0x20d   :  { %260 = vsyncpa [#allocation4], 1 }
 0x20e   :  { %261 = vsyncpa [#allocation7], 1 }
 0x20f   :  { %262 = vsyncpa [#allocation5], 1 }

</bundles_post_ra>
